<compile_context>
chip_gen: v5e
topology: v5e:2x2
jax: 0.10.0
libtpu: 0.0.40
codegen_flags: <defaults>
</compile_context>

<pallas_src>
import jax
import jax.numpy as jnp
from jax.experimental import pallas as pl
from jax.experimental.pallas import tpu as pltpu


# ----------------------------- Pallas kernel ------------------------------- #

def _drop_path_scale_kernel(x_ref, s_ref, o_ref):
    """x_ref/o_ref: (Bt, Lt) tile.  s_ref: (Bt, 1) per-sample scale (0 or 1/keep_prob)."""
    o_ref[...] = x_ref[...] * s_ref[...]


# ------------------------------ Tile picking -------------------------------- #

def _pick_tile(dim, candidates):
    """Largest candidate that exactly divides `dim`, else the full dim (valid block)."""
    for c in candidates:
        if c <= dim and dim % c == 0:
            return c
    return dim


# --------------------------------- Wrapper ----------------------------------- #

def drop_path(x, drop_prob=0.0, *, training=False, key=None):
    """DropPath forward. Identity in eval mode / drop_prob==0, else per-sample drop."""
    if drop_prob is None or drop_prob == 0.0 or not training:
        return x                                        # PyTorch fast path: return x

    keep_prob = 1.0 - float(drop_prob)
    B = x.shape[0]
    L = 1
    for d in x.shape[1:]:
        L *= d
    x2d = x.reshape(B, L)                               # contiguous, lane-dense view

    # Per-sample mask/scale, computed ONCE outside the per-tile hot path.
    # torch: random_tensor = floor(keep_prob + U[0,1)) -> 1 w.p. keep_prob else 0.
    if key is None:
        key = jax.random.PRNGKey(0)
    u = jax.random.uniform(key, (B, 1), dtype=jnp.float32)
    mask = jnp.floor(keep_prob + u)                     # (B, 1) in {0., 1.}
    scale = (mask * (1.0 / keep_prob)).astype(x.dtype)  # fold /keep_prob into the mask

    # Lane-dense, VMEM-friendly tiles (Lt multiple of 128, Bt multiple of 8 when possible).
    Bt = _pick_tile(B, (256, 128, 64, 32, 16, 8))
    Lt = _pick_tile(L, (4096, 2048, 1024, 512, 256, 128))
    grid = (B // Bt, L // Lt)

    itemsize = jnp.dtype(x.dtype).itemsize
    compiler_params = None
    if jax.default_backend() == "tpu":
        compiler_params = pltpu.CompilerParams(
            dimension_semantics=("parallel", "parallel"))

    out2d = pl.pallas_call(
        _drop_path_scale_kernel,
        out_shape=jax.ShapeDtypeStruct((B, L), x.dtype),
        grid=grid,
        in_specs=[
            pl.BlockSpec((Bt, Lt), lambda i, j: (i, j)),   # x tile
            pl.BlockSpec((Bt, 1), lambda i, j: (i, 0)),    # per-sample scale
        ],
        out_specs=pl.BlockSpec((Bt, Lt), lambda i, j: (i, j)),
        compiler_params=compiler_params,
        cost_estimate=pl.CostEstimate(
            flops=B * L,
            transcendentals=0,
            bytes_accessed=2 * B * L * itemsize + B * itemsize),
    )(x2d, scale)

    return out2d.reshape(x.shape)


# ---------------------------------- Main ------------------------------------- #

if __name__ == "__main__":
    B, N, C = 2, 8, 32          # (batch, tokens, hidden) as used in the ViT blocks
    drop_prob = 0.3
    keep_prob = 1.0 - drop_prob

    key = jax.random.PRNGKey(0)
    xkey, mkey = jax.random.split(key)
    x = jax.random.normal(xkey, (B, N, C), dtype=jnp.float32)

    # Eval mode and drop_prob == 0 are exact identity (PyTorch fast path).
    y_eval = drop_path(x, drop_prob, training=False)
    assert y_eval is x
    y_zero = drop_path(x, 0.0, training=True)
    assert y_zero is x

    # Training path: run the Pallas kernel.
    y = drop_path(x, drop_prob, training=True, key=mkey)
    y = jax.block_until_ready(y)
    assert y.shape == x.shape, y.shape

    # Structural check: every sample is either fully dropped (all zeros) or kept
    # and scaled by exactly 1/keep_prob. (Exact torch RNG stream can't be matched.)
    for b in range(B):
        yb = y[b]
        dropped = bool(jnp.max(jnp.abs(yb)) == 0.0)
        kept = bool(jnp.allclose(yb, x[b] / keep_prob, atol=1e-6, rtol=1e-6))
        assert dropped or kept, f"sample {b} is neither dropped nor scaled-kept"

    # Same key -> same mask -> identical output (deterministic).
    y2 = jax.block_until_ready(drop_path(x, drop_prob, training=True, key=mkey))
    assert bool(jnp.all(y2 == y))

    print("KERNEL_OK")
</pallas_src>

<mosaic_0001>
module attributes {stable_mosaic.version = 11 : i64} {
  func.func @_drop_path_scale_kernel(%arg0: i32, %arg1: i32, %arg2: memref<2x256xf32, #tpu.memory_space<vmem>>, %arg3: memref<2x1xf32, #tpu.memory_space<vmem>>, %arg4: memref<2x256xf32, #tpu.memory_space<vmem>>) attributes {dimension_semantics = [#tpu.dimension_semantics<arbitrary>, #tpu.dimension_semantics<arbitrary>], iteration_bounds = array<i64: 1, 1>, scalar_prefetch = 0 : i64, scratch_operands = 0 : i64, tpu.core_type = #tpu.core_type<tc>, window_params = [{transform_indices = @transform_0, window_bounds = array<i64: 2, 256>}, {transform_indices = @transform_1, window_bounds = array<i64: 2, 1>}, {transform_indices = @transform_2, window_bounds = array<i64: 2, 256>}]} {
    %c0 = arith.constant 0 : index
    %c0_0 = arith.constant 0 : index
    %0 = vector.load %arg2[%c0, %c0_0] : memref<2x256xf32, #tpu.memory_space<vmem>>, vector<2x256xf32>
    %c0_1 = arith.constant 0 : index
    %c0_2 = arith.constant 0 : index
    %1 = vector.load %arg3[%c0_1, %c0_2] : memref<2x1xf32, #tpu.memory_space<vmem>>, vector<2x1xf32>
    %2 = vector.broadcast %1 : vector<2x1xf32> to vector<2x256xf32>
    %3 = arith.mulf %0, %2 : vector<2x256xf32>
    %c0_3 = arith.constant 0 : index
    %c0_4 = arith.constant 0 : index
    %4 = vector.load %arg4[%c0_3, %c0_4] : memref<2x256xf32, #tpu.memory_space<vmem>>, vector<2x256xf32>
    tpu.vector_store %arg4[%c0_3, %c0_4], %3 {strides = array<i32>} : memref<2x256xf32, #tpu.memory_space<vmem>>, vector<2x256xf32>,
    return
  }
  func.func @transform_0(%arg0: i32, %arg1: i32) -> (i32, i32) {
    %c0_i32 = arith.constant 0 : i32
    return %arg0, %arg1 : i32, i32
  }
  func.func @transform_1(%arg0: i32, %arg1: i32) -> (i32, i32) {
    %c0_i32 = arith.constant 0 : i32
    %c0_i32_0 = arith.constant 0 : i32
    return %arg0, %c0_i32 : i32, i32
  }
  func.func @transform_2(%arg0: i32, %arg1: i32) -> (i32, i32) {
    %c0_i32 = arith.constant 0 : i32
    return %arg0, %arg1 : i32, i32
  }
}

</mosaic_0001>

<bundles_post_ra>
// kernel: tpu_custom_call.1
= control target key start
LH: loop header
LB: loop body
LE: loop exit
PB: predicated region body
PF: predicated region fallthrough
CT: control target
= control target key end

     0   :  { %7 = vsyncpa [#allocation3], 0  ;;  %s141_s0 = inlined_call_operand.hbm [shape: f32[2,256], index: 0, kind: input, shape index: {}]   ;;  %s142_s1 = inlined_call_operand.vmem [shape: f32[2,1], index: 1, kind: input, shape index: {}]   ;;  %s143_s2 = inlined_call_operand.hbm [shape: f32[2,256], index: 2, kind: output, shape index: {}]  }
   0x1   :  { %8 = vsyncpa [#allocation4], 0  ;;  %s14_s11 = sshll.u32 %s141_s0, 4  ;;  %s113_s12 = smov [#allocation2]   ;;  %s15_s11 = int_to_ptr.hbm [resolvable:$true] %s14_s11 }
   0x2   :  { %s16_s13 = sshll.u32 %s113_s12, 4  ;;  %s17_s13 = int_to_ptr.vmem [resolvable:$true] %s16_s13 }
   0x3   :  { %19 = dma.hbm_to_vmem [thread:$0]  %s15_s11, 64, %s17_s13, [#allocation3]  }
   0x4   :  { %109 = dma.done.wait [#allocation3], 64  }
   0x5   :  { %110 = vsyncadd [#allocation3], 4294967232  ;;  %v114_v0 = vmov 0   ;;  %v27_v1 = vld [vmem:[%s142_s1] sm:$0x3]  ;;  %s116_s0 = smov [#allocation5]  }
   0x6   :  { %60 = vset.pattern.permute.xlu0 %v114_v0  ;;  %v115_v2 = vmov 269488144   ;;  %v26_v6 = vld [vmem:[#allocation2] sm:$0xf]  ;;  %s44_s16 = sshll.u32 %s116_s0, 4  ;;  %s46_s19 = sshll.u32 %s143_s2, 4  ;;  %s45_s16 = int_to_ptr.vmem [resolvable:$true] %s44_s16  ;;  %s47_s19 = int_to_ptr.hbm [resolvable:$true] %s46_s19 }
   0x7   :  { %30 = vperm.xlu0 %60, %v27_v1   ;;  %v33_v3 = vunpack.c.l.s4 %v115_v2 }
   0x9   :  { %v34_v4 = vunpack.c.0.s8 %v33_v3 }
  0x79   :  { %v31_v5 = vpop.permute.xlu0 %30 }
  0x7a   :  { %v35_v7 = vperm.slane %v31_v5, %v34_v4 }
  0x7c   :  { %v37_v8 = vmul.f32 %v35_v7, %v26_v6 }
  0x7e   :  { %38 = vst [vmem:[#allocation5] sm:$0xf] %v37_v8 }
  0x7f   :  { %49 = dma.vmem_to_hbm [thread:$0]  %s45_s16, 64, %s47_s19, [#allocation4]  }
  0x80   :  { %111 = dma.done.wait [#allocation4], 64  }
  0x81   :  { %112 = vsyncadd [#allocation4], 4294967232 }
  0x82   :  { %54 = vsyncpa [#allocation3], 1 }
  0x83   :  { %55 = vsyncpa [#allocation4], 1 }

</bundles_post_ra>
